<compile_context>
chip_gen: v5e
topology: v5e:2x2
jax: 0.10.0
libtpu: 0.0.40
codegen_flags: <defaults>
</compile_context>

<pallas_src>
import math

import jax
import jax.numpy as jnp
from jax.experimental import pallas as pl
from jax.experimental.pallas import tpu as pltpu


def _add_pe_kernel(x_ref, pe_ref, o_ref):
    """out = x + pe, with pe broadcast over the batch (sublane) dimension.

    x_ref / o_ref block: (ts, B, D);  pe_ref block: (ts, 1, D).
    """
    o_ref[...] = x_ref[...] + pe_ref[...]


def make_positional_encoding_table(d_model, max_len=10000, dtype=jnp.float32):
    """Init-time sinusoidal table; exact analogue of the PyTorch register_buffer."""
    position = jnp.arange(max_len, dtype=jnp.float32)[:, None]            # (L, 1)
    div_term = jnp.exp(jnp.arange(0, d_model, 2, dtype=jnp.float32)
                       * (-math.log(10000.0) / d_model))                  # (D/2,)
    angles = position * div_term                                          # (L, D/2)
    pe = jnp.zeros((max_len, d_model), jnp.float32)
    pe = pe.at[:, 0::2].set(jnp.sin(angles))
    pe = pe.at[:, 1::2].set(jnp.cos(angles))
    return pe.astype(dtype)                                               # (L, D)


def _pick_seq_tile(S, B, D, itemsize, vmem_budget_bytes=8 * 1024 * 1024):
    """Largest seq tile whose double-buffered working set fits the budget and
    that divides S (keeps every block full -> no masked edge stores)."""
    bytes_per_row = (2 * B * D + D) * itemsize * 2   # x + out + pe, double-buffered
    tile = max(1, min(S, vmem_budget_bytes // max(bytes_per_row, 1)))
    while S % tile != 0:
        tile -= 1
    return tile


def positional_encoding_forward(x, pe):
    """Forward pass of PositionalEncoding.

    x : (S, B, D) activations (seq-first, as the PyTorch module expects).
    pe: (max_len, D) precomputed sinusoidal table.
    Returns x + pe[:S] broadcast over the batch dimension.
    """
    S, B, D = x.shape
    pe_s = pe[:S].astype(x.dtype)[:, None, :]          # (S, 1, D)

    ts = _pick_seq_tile(S, B, D, x.dtype.itemsize)
    grid = (S // ts,)

    return pl.pallas_call(
        _add_pe_kernel,
        out_shape=jax.ShapeDtypeStruct((S, B, D), x.dtype),
        grid=grid,
        in_specs=[
            pl.BlockSpec((ts, B, D), lambda s: (s, 0, 0)),
            pl.BlockSpec((ts, 1, D), lambda s: (s, 0, 0)),
        ],
        out_specs=pl.BlockSpec((ts, B, D), lambda s: (s, 0, 0)),
        compiler_params=pltpu.CompilerParams(
            dimension_semantics=("parallel",)),
    )(x, pe_s)


if __name__ == "__main__":
    d_model, max_len = 32, 10000
    seq, batch = 8, 2

    key = jax.random.PRNGKey(0)
    x = jax.random.normal(key, (seq, batch, d_model), jnp.float32)

    pe = make_positional_encoding_table(d_model, max_len)

    out = jax.block_until_ready(positional_encoding_forward(x, pe))

    # reference (pure-JAX) check of the forward semantics
    ref = x + pe[:seq][:, None, :]

    assert out.shape == (seq, batch, d_model), out.shape
    assert bool(jnp.all(jnp.isfinite(out)))
    assert bool(jnp.allclose(out, ref, atol=1e-6, rtol=1e-6))
    print("KERNEL_OK")
</pallas_src>

<mosaic_0001>
module attributes {stable_mosaic.version = 11 : i64} {
  func.func @_add_pe_kernel(%arg0: i32, %arg1: memref<8x2x32xf32, #tpu.memory_space<vmem>>, %arg2: memref<8x1x32xf32, #tpu.memory_space<vmem>>, %arg3: memref<8x2x32xf32, #tpu.memory_space<vmem>>) attributes {dimension_semantics = [#tpu.dimension_semantics<parallel>], iteration_bounds = array<i64: 1>, scalar_prefetch = 0 : i64, scratch_operands = 0 : i64, tpu.core_type = #tpu.core_type<tc>, window_params = [{transform_indices = @transform_0, window_bounds = array<i64: 8, 2, 32>}, {transform_indices = @transform_1, window_bounds = array<i64: 8, 1, 32>}, {transform_indices = @transform_2, window_bounds = array<i64: 8, 2, 32>}]} {
    %c0 = arith.constant 0 : index
    %c0_0 = arith.constant 0 : index
    %c0_1 = arith.constant 0 : index
    %0 = vector.load %arg1[%c0, %c0_0, %c0_1] : memref<8x2x32xf32, #tpu.memory_space<vmem>>, vector<8x2x32xf32>
    %c0_2 = arith.constant 0 : index
    %c0_3 = arith.constant 0 : index
    %c0_4 = arith.constant 0 : index
    %1 = vector.load %arg2[%c0_2, %c0_3, %c0_4] : memref<8x1x32xf32, #tpu.memory_space<vmem>>, vector<8x1x32xf32>
    %2 = vector.broadcast %1 : vector<8x1x32xf32> to vector<8x2x32xf32>
    %3 = arith.addf %0, %2 : vector<8x2x32xf32>
    %c0_5 = arith.constant 0 : index
    %c0_6 = arith.constant 0 : index
    %c0_7 = arith.constant 0 : index
    %4 = vector.load %arg3[%c0_5, %c0_6, %c0_7] : memref<8x2x32xf32, #tpu.memory_space<vmem>>, vector<8x2x32xf32>
    tpu.vector_store %arg3[%c0_5, %c0_6, %c0_7], %3 {strides = array<i32>} : memref<8x2x32xf32, #tpu.memory_space<vmem>>, vector<8x2x32xf32>,
    return
  }
  func.func @transform_0(%arg0: i32) -> (i32, i32, i32) {
    %c0_i32 = arith.constant 0 : i32
    %c0_i32_0 = arith.constant 0 : i32
    %c0_i32_1 = arith.constant 0 : i32
    return %arg0, %c0_i32, %c0_i32_0 : i32, i32, i32
  }
  func.func @transform_1(%arg0: i32) -> (i32, i32, i32) {
    %c0_i32 = arith.constant 0 : i32
    %c0_i32_0 = arith.constant 0 : i32
    %c0_i32_1 = arith.constant 0 : i32
    return %arg0, %c0_i32, %c0_i32_0 : i32, i32, i32
  }
  func.func @transform_2(%arg0: i32) -> (i32, i32, i32) {
    %c0_i32 = arith.constant 0 : i32
    %c0_i32_0 = arith.constant 0 : i32
    %c0_i32_1 = arith.constant 0 : i32
    return %arg0, %c0_i32, %c0_i32_0 : i32, i32, i32
  }
}

</mosaic_0001>

<bundles_post_ra>
// kernel: tpu_custom_call.1
= control target key start
LH: loop header
LB: loop body
LE: loop exit
PB: predicated region body
PF: predicated region fallthrough
CT: control target
= control target key end

     0   :  { %7 = vsyncpa [#allocation3], 0  ;;  %s266_s0 = inlined_call_operand.hbm [shape: f32[8,2,32], index: 0, kind: input, shape index: {}]   ;;  %s267_s1 = inlined_call_operand.hbm [shape: f32[8,1,32], index: 1, kind: input, shape index: {}]   ;;  %s268_s2 = inlined_call_operand.hbm [shape: f32[8,2,32], index: 2, kind: output, shape index: {}]  }
   0x1   :  { %8 = vsyncpa [#allocation6], 0 }
   0x2   :  { %9 = vsyncpa [#allocation4], 0  ;;  %s14_s11 = sshll.u32 %s266_s0, 4  ;;  %s214_s12 = smov [#allocation2]   ;;  %s15_s11 = int_to_ptr.hbm [resolvable:$true] %s14_s11 }
   0x3   :  { %s16_s13 = sshll.u32 %s214_s12, 4  ;;  %s27_s16 = sshll.u32 %s267_s1, 4  ;;  %s17_s13 = int_to_ptr.vmem [resolvable:$true] %s16_s13  ;;  %s28_s16 = int_to_ptr.hbm [resolvable:$true] %s27_s16 }
   0x4   :  { %s215_s17 = smov 32   ;;  %s216_s18 = smov 2  }
   0x5   :  { %22 = dma.hbm_to_vmem [thread:$0]  %s15_s11, 256, %s17_s13, [#allocation3], %s215_s17, %s215_s17, %s216_s18  }
   0x6   :  { %s217_s19 = smov [#allocation5]   ;;  %s218_s21 = smov 16  }
   0x7   :  { %s29_s20 = sshll.u32 %s217_s19, 4  ;;  %s219_s0 = smov 1   ;;  %s30_s20 = int_to_ptr.vmem [resolvable:$true] %s29_s20 }
   0x8   :  { %35 = dma.hbm_to_vmem [thread:$0]  %s28_s16, 128, %s30_s20, [#allocation6], %s218_s21, %s218_s21, %s219_s0  }
   0x9   :  { %208 = dma.done.wait [#allocation3], 256  }
   0xa   :  { %209 = vsyncadd [#allocation3], 4294967040 }
   0xb   :  { %210 = dma.done.wait [#allocation6], 128  }
   0xc   :  { %211 = vsyncadd [#allocation6], 4294967168  ;;  %vm92_vm0 = vcmask 254976   ;;  %s220_s22 = smov [#allocation7]   ;;  %s107_s25 = sshll.u32 %s268_s2, 4  ;;  %s108_s25 = int_to_ptr.hbm [resolvable:$true] %s107_s25 }
   0xd   :  { %s245_s1 = sshll.u32 %s220_s22, 4  ;;  %v44_v0 = vld [vmem:[#allocation2] sm:$0x3]  ;;  %v128_v1 = vld [vmem:[#allocation5] ss:$0 sm:$0xff]  ;;  %s106_s1 = int_to_ptr.vmem [resolvable:$true] %s245_s1 }
   0xe   :  { %v45_v2 = vld [vmem:[#allocation2 + $0x2] sm:$0x3]  ;;  %v129_v3 = vld [vmem:[#allocation5 + $0x1] ss:$0 sm:$0xff]  ;;  %v84_v4 = vadd.f32 %v128_v1, %v44_v0  ;;  %v46_v5 = vld [vmem:[#allocation2 + $0x4] sm:$0x3] }
   0xf   :  { %v130_v6 = vld [vmem:[#allocation5 + $0x2] ss:$0 sm:$0xff]  ;;  %v85_v7 = vadd.f32 %v129_v3, %v45_v2  ;;  %v47_v8 = vld [vmem:[#allocation2 + $0x6] sm:$0x3]  ;;  %v131_v9 = vld [vmem:[#allocation5 + $0x3] ss:$0 sm:$0xff] }
  0x10   :  { %93 = vst.msk [vmem:[#allocation7] sm:$0x3] %vm92_vm0, %v84_v4  ;;  %v86_v10 = vadd.f32 %v130_v6, %v46_v5  ;;  %v48_v11 = vld [vmem:[#allocation2 + $0x8] sm:$0x3]  ;;  %v87_v12 = vadd.f32 %v131_v9, %v47_v8  ;;  %v132_v13 = vld [vmem:[#allocation5 + $0x4] ss:$0 sm:$0xff] }
  0x11   :  { %94 = vst.msk [vmem:[#allocation7 + $0x2] sm:$0x3] %vm92_vm0, %v85_v7  ;;  %v49_v14 = vld [vmem:[#allocation2 + $0xa] sm:$0x3]  ;;  %v133_v15 = vld [vmem:[#allocation5 + $0x5] ss:$0 sm:$0xff]  ;;  %v88_v16 = vadd.f32 %v132_v13, %v48_v11 }
  0x12   :  { %95 = vst.msk [vmem:[#allocation7 + $0x4] sm:$0x3] %vm92_vm0, %v86_v10  ;;  %v50_v17 = vld [vmem:[#allocation2 + $0xc] sm:$0x3]  ;;  %v89_v18 = vadd.f32 %v133_v15, %v49_v14  ;;  %v134_v19 = vld [vmem:[#allocation5 + $0x6] ss:$0 sm:$0xff] }
  0x13   :  { %96 = vst.msk [vmem:[#allocation7 + $0x6] sm:$0x3] %vm92_vm0, %v87_v12  ;;  %v51_v20 = vld [vmem:[#allocation2 + $0xe] sm:$0x3]  ;;  %v135_v21 = vld [vmem:[#allocation5 + $0x7] ss:$0 sm:$0xff]  ;;  %v90_v22 = vadd.f32 %v134_v19, %v50_v17 }
  0x14   :  { %97 = vst.msk [vmem:[#allocation7 + $0x8] sm:$0x3] %vm92_vm0, %v88_v16  ;;  %v91_v23 = vadd.f32 %v135_v21, %v51_v20 }
  0x15   :  { %98 = vst.msk [vmem:[#allocation7 + $0xa] sm:$0x3] %vm92_vm0, %v89_v18 }
  0x16   :  { %99 = vst.msk [vmem:[#allocation7 + $0xc] sm:$0x3] %vm92_vm0, %v90_v22 }
  0x17   :  { %100 = vst.msk [vmem:[#allocation7 + $0xe] sm:$0x3] %vm92_vm0, %v91_v23 }
  0x18   :  { %113 = dma.vmem_to_hbm [thread:$0]  %s106_s1, 256, %s108_s25, [#allocation4], %s215_s17, %s215_s17, %s216_s18  }
  0x19   :  { %212 = dma.done.wait [#allocation4], 256  }
  0x1a   :  { %213 = vsyncadd [#allocation4], 4294967040 }
  0x1b   :  { %118 = vsyncpa [#allocation3], 1 }
  0x1c   :  { %119 = vsyncpa [#allocation6], 1 }
  0x1d   :  { %120 = vsyncpa [#allocation4], 1 }

</bundles_post_ra>
